<compile_context>
chip_gen: v5e
topology: v5e:2x2
jax: 0.10.0
libtpu: 0.0.40
codegen_flags: <defaults>
</compile_context>

<pallas_src>
import jax
import jax.numpy as jnp
from jax.experimental import pallas as pl
from jax.experimental.pallas import tpu as pltpu


def _cnn_kernel(x_ref, w1_ref, b1_ref, w2_ref, b2_ref, wf_ref, bf_ref, out_ref):
    # x_ref : (BM, L)   float32 batch tile
    # w1_ref: (3, 32)   w1k[k, co] = torch conv1.weight[co, 0, k]
    # b1_ref: (1, 32)
    # w2_ref: (96, 64)  row k*32+ci = torch conv2.weight[co, ci, k], col co
    # b2_ref: (1, 64)
    # wf_ref: (1, 64)   fc weight row, pre-scaled by 1/L2 (mean pooling folded in)
    # bf_ref: (1, 1)
    # out_ref: (BM, 1)
    x = x_ref[...]
    BM, L = x.shape
    L1 = L - 2   # length after conv1 (valid, k=3)
    L2 = L - 4   # length after conv2

    w1 = w1_ref[...]
    b1 = b1_ref[...].reshape(1, 1, 32)
    w2 = w2_ref[...]
    b2 = b2_ref[...]
    wf = wf_ref[...]
    bf = bf_ref[...]

    # ---- conv1 (1 -> 32): three broadcast FMAs on the VPU --------------------
    x3 = x[:, :, None]                                          # one relayout, reused by all taps
    h1 = (x3[:, 0:L1, :] * w1[0:1, :].reshape(1, 1, 32)
          + x3[:, 1:L1 + 1, :] * w1[1:2, :].reshape(1, 1, 32)
          + x3[:, 2:L1 + 2, :] * w1[2:3, :].reshape(1, 1, 32)
          + b1)
    h1 = jnp.maximum(h1, 0.0)                                   # (BM, L1, 32)

    # ---- conv2 (32 -> 64): three taps fused into one K=96 MXU matmul ---------
    lhs = jnp.concatenate(
        [h1[:, 0:L2, :], h1[:, 1:L2 + 1, :], h1[:, 2:L2 + 2, :]],
        axis=-1)                                                # (BM, L2, 96)
    h2 = jnp.dot(lhs.reshape(BM * L2, 96), w2,
                 preferred_element_type=jnp.float32)            # (BM*L2, 64)
    h2 = jnp.maximum(h2 + b2, 0.0).reshape(BM, L2, 64)

    # ---- temporal mean pool + fc (1/L2 folded into wf; VPU mul + lane reduce) -
    pooled = jnp.sum(h2, axis=1)                                # (BM, 64)
    out_ref[...] = jnp.sum(pooled * wf, axis=-1, keepdims=True) + bf


def _pick_block_b(B, L):
    """Largest batch tile that keeps the f32 intermediates under ~20 MiB of VMEM."""
    budget = 20 * 1024 * 1024
    L1 = max(L - 2, 1)
    L2 = max(L - 4, 1)
    per_row = 4 * (2 * L                      # double-buffered x tile
                   + 2 * 32 * L1              # x3 + h1
                   + (96 + 2 * 64) * L2       # conv2 LHS + h2 (+acc)
                   ) + 1024
    bm = budget // per_row
    if bm >= B:
        return B                              # single full block (exact array dims)
    bm = max(8, (bm // 8) * 8)                # keep sublane-aligned tiles
    return min(bm, B)


def simple_cnn_forward(x, w1, b1, w2, b2, wf, bf):
    """x: (B, L, 1) float32 -> (B, 1) float32, matching SimpleCNN.forward."""
    B, L, C = x.shape
    assert C == 1 and L >= 5
    x2d = x[:, :, 0].astype(jnp.float32)                        # (B, L)

    # One-time, wrapper-side parameter re-layout (kernel body stays pure compute).
    w1k = jnp.transpose(w1[:, 0, :].astype(jnp.float32), (1, 0))          # (3, 32), [k, co]
    b1k = b1.astype(jnp.float32).reshape(1, 32)
    # torch conv2.weight[co, ci, k] -> row index k*32 + ci, col co.
    w2k = jnp.transpose(w2.astype(jnp.float32), (2, 1, 0)).reshape(96, 64)
    b2k = b2.astype(jnp.float32).reshape(1, 64)
    # Fold the temporal-mean 1/L2 into the fc weight.
    wfk = (wf.astype(jnp.float32) / float(L - 4)).reshape(1, 64)
    bfk = bf.astype(jnp.float32).reshape(1, 1)

    bm = _pick_block_b(B, L)
    grid = (pl.cdiv(B, bm),)

    def const2(i):
        return (0, 0)

    return pl.pallas_call(
        _cnn_kernel,
        out_shape=jax.ShapeDtypeStruct((B, 1), jnp.float32),
        grid=grid,
        in_specs=[
            pl.BlockSpec((bm, L), lambda i: (i, 0)),     # x tile, pipelined per step
            pl.BlockSpec((3, 32), const2),               # weights stay resident in VMEM
            pl.BlockSpec((1, 32), const2),
            pl.BlockSpec((96, 64), const2),
            pl.BlockSpec((1, 64), const2),
            pl.BlockSpec((1, 64), const2),
            pl.BlockSpec((1, 1), const2),
        ],
        out_specs=pl.BlockSpec((bm, 1), lambda i: (i, 0)),
        compiler_params=pltpu.CompilerParams(
            dimension_semantics=("parallel",),           # megacore split on v7x
            vmem_limit_bytes=48 * 1024 * 1024,
        ),
    )(x2d, w1k, b1k, w2k, b2k, wfk, bfk)


def _reference_forward(x, w1, b1, w2, b2, wf, bf):
    """Pure-JAX reference with the same semantics as the PyTorch module."""
    xt = jnp.transpose(x, (0, 2, 1))                            # (B, 1, L)
    h1 = jax.lax.conv_general_dilated(
        xt, w1, (1,), "VALID",
        dimension_numbers=("NCH", "OIH", "NCH")) + b1[None, :, None]
    h1 = jax.nn.relu(h1)
    h2 = jax.lax.conv_general_dilated(
        h1, w2, (1,), "VALID",
        dimension_numbers=("NCH", "OIH", "NCH")) + b2[None, :, None]
    h2 = jax.nn.relu(h2)
    pooled = jnp.mean(h2, axis=2)                               # (B, 64)
    return pooled @ wf.T + bf[None, :]


if __name__ == "__main__":
    key = jax.random.PRNGKey(0)
    kx, k1, k2, k3, k4, k5, k6 = jax.random.split(key, 7)

    B, L = 2, 16
    x = jax.random.normal(kx, (B, L, 1), jnp.float32)

    # Deterministic synthetic parameters (PyTorch weight shapes).
    w1 = jax.random.normal(k1, (32, 1, 3), jnp.float32) * 0.2   # conv1.weight
    b1 = jax.random.normal(k2, (32,), jnp.float32) * 0.1        # conv1.bias
    w2 = jax.random.normal(k3, (64, 32, 3), jnp.float32) * 0.1  # conv2.weight
    b2 = jax.random.normal(k4, (64,), jnp.float32) * 0.1        # conv2.bias
    wf = jax.random.normal(k5, (1, 64), jnp.float32) * 0.1      # fc.weight
    bf = jax.random.normal(k6, (1,), jnp.float32) * 0.1         # fc.bias

    out = jax.block_until_ready(simple_cnn_forward(x, w1, b1, w2, b2, wf, bf))
    ref = _reference_forward(x, w1, b1, w2, b2, wf, bf)
    assert out.shape == (B, 1)
    assert jnp.allclose(out, ref, atol=1e-4, rtol=1e-4), (out, ref)

    print("KERNEL_OK")
</pallas_src>

<mosaic_0001>
module attributes {stable_mosaic.version = 11 : i64} {
  func.func @_cnn_kernel(%arg0: i32, %arg1: memref<2x16xf32, #tpu.memory_space<vmem>>, %arg2: memref<3x32xf32, #tpu.memory_space<vmem>>, %arg3: memref<1x32xf32, #tpu.memory_space<vmem>>, %arg4: memref<96x64xf32, #tpu.memory_space<vmem>>, %arg5: memref<1x64xf32, #tpu.memory_space<vmem>>, %arg6: memref<1x64xf32, #tpu.memory_space<vmem>>, %arg7: memref<1x1xf32, #tpu.memory_space<vmem>>, %arg8: memref<2x1xf32, #tpu.memory_space<vmem>>) attributes {dimension_semantics = [#tpu.dimension_semantics<parallel>], iteration_bounds = array<i64: 1>, scalar_prefetch = 0 : i64, scratch_operands = 0 : i64, tpu.core_type = #tpu.core_type<tc>, window_params = [{transform_indices = @transform_0, window_bounds = array<i64: 2, 16>}, {pipeline_mode = #tpu.pipeline_mode<synchronous>, transform_indices = @transform_1, window_bounds = array<i64: 3, 32>}, {pipeline_mode = #tpu.pipeline_mode<synchronous>, transform_indices = @transform_2, window_bounds = array<i64: 1, 32>}, {pipeline_mode = #tpu.pipeline_mode<synchronous>, transform_indices = @transform_3, window_bounds = array<i64: 96, 64>}, {pipeline_mode = #tpu.pipeline_mode<synchronous>, transform_indices = @transform_4, window_bounds = array<i64: 1, 64>}, {pipeline_mode = #tpu.pipeline_mode<synchronous>, transform_indices = @transform_5, window_bounds = array<i64: 1, 64>}, {pipeline_mode = #tpu.pipeline_mode<synchronous>, transform_indices = @transform_6, window_bounds = array<i64: 1, 1>}, {transform_indices = @transform_7, window_bounds = array<i64: 2, 1>}]} {
    %c0 = arith.constant 0 : index
    %c0_0 = arith.constant 0 : index
    %0 = vector.load %arg1[%c0, %c0_0] : memref<2x16xf32, #tpu.memory_space<vmem>>, vector<2x16xf32>
    %c0_1 = arith.constant 0 : index
    %c0_2 = arith.constant 0 : index
    %1 = vector.load %arg2[%c0_1, %c0_2] : memref<3x32xf32, #tpu.memory_space<vmem>>, vector<3x32xf32>
    %c0_3 = arith.constant 0 : index
    %c0_4 = arith.constant 0 : index
    %2 = vector.load %arg3[%c0_3, %c0_4] : memref<1x32xf32, #tpu.memory_space<vmem>>, vector<1x32xf32>
    %3 = vector.shape_cast %2 : vector<1x32xf32> to vector<1x1x32xf32>
    %c0_5 = arith.constant 0 : index
    %c0_6 = arith.constant 0 : index
    %4 = vector.load %arg4[%c0_5, %c0_6] : memref<96x64xf32, #tpu.memory_space<vmem>>, vector<96x64xf32>
    %c0_7 = arith.constant 0 : index
    %c0_8 = arith.constant 0 : index
    %5 = vector.load %arg5[%c0_7, %c0_8] : memref<1x64xf32, #tpu.memory_space<vmem>>, vector<1x64xf32>
    %c0_9 = arith.constant 0 : index
    %c0_10 = arith.constant 0 : index
    %6 = vector.load %arg6[%c0_9, %c0_10] : memref<1x64xf32, #tpu.memory_space<vmem>>, vector<1x64xf32>
    %c0_11 = arith.constant 0 : index
    %c0_12 = arith.constant 0 : index
    %7 = vector.load %arg7[%c0_11, %c0_12] : memref<1x1xf32, #tpu.memory_space<vmem>>, vector<1x1xf32>
    %8 = vector.shape_cast %0 : vector<2x16xf32> to vector<2x16x1xf32>
    %9 = vector.extract_strided_slice %8 {offsets = [0, 0, 0], sizes = [2, 14, 1], strides = [1, 1, 1]} : vector<2x16x1xf32> to vector<2x14x1xf32>
    %10 = vector.extract_strided_slice %1 {offsets = [0, 0], sizes = [1, 32], strides = [1, 1]} : vector<3x32xf32> to vector<1x32xf32>
    %11 = vector.shape_cast %10 : vector<1x32xf32> to vector<1x1x32xf32>
    %12 = vector.broadcast %9 : vector<2x14x1xf32> to vector<2x14x32xf32>
    %13 = vector.broadcast %11 : vector<1x1x32xf32> to vector<2x14x32xf32>
    %14 = arith.mulf %12, %13 : vector<2x14x32xf32>
    %15 = vector.extract_strided_slice %8 {offsets = [0, 1, 0], sizes = [2, 14, 1], strides = [1, 1, 1]} : vector<2x16x1xf32> to vector<2x14x1xf32>
    %16 = vector.extract_strided_slice %1 {offsets = [1, 0], sizes = [1, 32], strides = [1, 1]} : vector<3x32xf32> to vector<1x32xf32>
    %17 = vector.shape_cast %16 : vector<1x32xf32> to vector<1x1x32xf32>
    %18 = vector.broadcast %15 : vector<2x14x1xf32> to vector<2x14x32xf32>
    %19 = vector.broadcast %17 : vector<1x1x32xf32> to vector<2x14x32xf32>
    %20 = arith.mulf %18, %19 : vector<2x14x32xf32>
    %21 = arith.addf %14, %20 : vector<2x14x32xf32>
    %22 = vector.extract_strided_slice %8 {offsets = [0, 2, 0], sizes = [2, 14, 1], strides = [1, 1, 1]} : vector<2x16x1xf32> to vector<2x14x1xf32>
    %23 = vector.extract_strided_slice %1 {offsets = [2, 0], sizes = [1, 32], strides = [1, 1]} : vector<3x32xf32> to vector<1x32xf32>
    %24 = vector.shape_cast %23 : vector<1x32xf32> to vector<1x1x32xf32>
    %25 = vector.broadcast %22 : vector<2x14x1xf32> to vector<2x14x32xf32>
    %26 = vector.broadcast %24 : vector<1x1x32xf32> to vector<2x14x32xf32>
    %27 = arith.mulf %25, %26 : vector<2x14x32xf32>
    %28 = arith.addf %21, %27 : vector<2x14x32xf32>
    %29 = vector.broadcast %3 : vector<1x1x32xf32> to vector<2x14x32xf32>
    %30 = arith.addf %28, %29 : vector<2x14x32xf32>
    %cst = arith.constant 0.000000e+00 : f32
    %31 = vector.broadcast %cst : f32 to vector<2x14x32xf32>
    %32 = arith.maximumf %30, %31 : vector<2x14x32xf32>
    %33 = vector.extract_strided_slice %32 {offsets = [0, 0, 0], sizes = [2, 12, 32], strides = [1, 1, 1]} : vector<2x14x32xf32> to vector<2x12x32xf32>
    %34 = vector.extract_strided_slice %32 {offsets = [0, 1, 0], sizes = [2, 12, 32], strides = [1, 1, 1]} : vector<2x14x32xf32> to vector<2x12x32xf32>
    %35 = vector.extract_strided_slice %32 {offsets = [0, 2, 0], sizes = [2, 12, 32], strides = [1, 1, 1]} : vector<2x14x32xf32> to vector<2x12x32xf32>
    %36 = tpu.concatenate %33, %34, %35 in 2 : vector<2x12x32xf32>, vector<2x12x32xf32>, vector<2x12x32xf32> -> vector<2x12x96xf32>
    %37 = vector.shape_cast %36 : vector<2x12x96xf32> to vector<24x96xf32>
    %cst_13 = arith.constant dense<0.000000e+00> : vector<24x64xf32>
    %38 = tpu.matmul %37, %4, %cst_13 {dimension_numbers = #tpu.dot_dimension_numbers<[1], [0], [0], [1], [0, 0, 1, 1], [], []>} : vector<24x96xf32>, vector<96x64xf32>, vector<24x64xf32> -> vector<24x64xf32>
    %39 = vector.broadcast %5 : vector<1x64xf32> to vector<24x64xf32>
    %40 = arith.addf %38, %39 : vector<24x64xf32>
    %cst_14 = arith.constant 0.000000e+00 : f32
    %41 = vector.broadcast %cst_14 : f32 to vector<24x64xf32>
    %42 = arith.maximumf %40, %41 : vector<24x64xf32>
    %43 = vector.shape_cast %42 : vector<24x64xf32> to vector<2x12x64xf32>
    %cst_15 = arith.constant dense<0.000000e+00> : vector<2x64xf32>
    %44 = vector.multi_reduction <add>, %43, %cst_15 [1] : vector<2x12x64xf32> to vector<2x64xf32>
    %45 = vector.broadcast %6 : vector<1x64xf32> to vector<2x64xf32>
    %46 = arith.mulf %44, %45 : vector<2x64xf32>
    %cst_16 = arith.constant dense<0.000000e+00> : vector<2xf32>
    %47 = vector.multi_reduction <add>, %46, %cst_16 [1] : vector<2x64xf32> to vector<2xf32>
    %48 = vector.shape_cast %47 : vector<2xf32> to vector<2x1xf32>
    %49 = vector.broadcast %7 : vector<1x1xf32> to vector<2x1xf32>
    %50 = arith.addf %48, %49 : vector<2x1xf32>
    %c0_17 = arith.constant 0 : index
    %c0_18 = arith.constant 0 : index
    %51 = vector.load %arg8[%c0_17, %c0_18] : memref<2x1xf32, #tpu.memory_space<vmem>>, vector<2x1xf32>
    tpu.vector_store %arg8[%c0_17, %c0_18], %50 {strides = array<i32>} : memref<2x1xf32, #tpu.memory_space<vmem>>, vector<2x1xf32>,
    return
  }
  func.func @transform_0(%arg0: i32) -> (i32, i32) {
    %c0_i32 = arith.constant 0 : i32
    %c0_i32_0 = arith.constant 0 : i32
    return %arg0, %c0_i32 : i32, i32
  }
  func.func @transform_1(%arg0: i32) -> (i32, i32) {
    %c0_i32 = arith.constant 0 : i32
    %c0_i32_0 = arith.constant 0 : i32
    %c0_i32_1 = arith.constant 0 : i32
    return %c0_i32, %c0_i32_0 : i32, i32
  }
  func.func @transform_2(%arg0: i32) -> (i32, i32) {
    %c0_i32 = arith.constant 0 : i32
    %c0_i32_0 = arith.constant 0 : i32
    %c0_i32_1 = arith.constant 0 : i32
    return %c0_i32, %c0_i32_0 : i32, i32
  }
  func.func @transform_3(%arg0: i32) -> (i32, i32) {
    %c0_i32 = arith.constant 0 : i32
    %c0_i32_0 = arith.constant 0 : i32
    %c0_i32_1 = arith.constant 0 : i32
    return %c0_i32, %c0_i32_0 : i32, i32
  }
  func.func @transform_4(%arg0: i32) -> (i32, i32) {
    %c0_i32 = arith.constant 0 : i32
    %c0_i32_0 = arith.constant 0 : i32
    %c0_i32_1 = arith.constant 0 : i32
    return %c0_i32, %c0_i32_0 : i32, i32
  }
  func.func @transform_5(%arg0: i32) -> (i32, i32) {
    %c0_i32 = arith.constant 0 : i32
    %c0_i32_0 = arith.constant 0 : i32
    %c0_i32_1 = arith.constant 0 : i32
    return %c0_i32, %c0_i32_0 : i32, i32
  }
  func.func @transform_6(%arg0: i32) -> (i32, i32) {
    %c0_i32 = arith.constant 0 : i32
    %c0_i32_0 = arith.constant 0 : i32
    %c0_i32_1 = arith.constant 0 : i32
    return %c0_i32, %c0_i32_0 : i32, i32
  }
  func.func @transform_7(%arg0: i32) -> (i32, i32) {
    %c0_i32 = arith.constant 0 : i32
    %c0_i32_0 = arith.constant 0 : i32
    return %arg0, %c0_i32 : i32, i32
  }
}

</mosaic_0001>

<bundles_post_ra>
// kernel: tpu_custom_call.1
= control target key start
LH: loop header
LB: loop body
LE: loop exit
PB: predicated region body
PF: predicated region fallthrough
CT: control target
= control target key end

     0   :  { %v47_v0 = vlaneseq  ;;  %vm110_vm0 = vcmask 1045504   ;;  %vm86_vm1 = vcmask 1046528   ;;  %s352_s28 = smov 32   ;;  %vm176_vm2 = vcmask 261120   ;;  %s488_s0 = inlined_call_operand.vmem [shape: f32[2,16], index: 0, kind: input, shape index: {}]   ;;  %s489_s2 = inlined_call_operand.vmem [shape: f32[1,32], index: 2, kind: input, shape index: {}]   ;;  %s490_s1 = inlined_call_operand.vmem [shape: f32[3,32], index: 1, kind: input, shape index: {}]   ;;  %s491_s4 = inlined_call_operand.vmem [shape: f32[1,64], index: 4, kind: input, shape index: {}]   ;;  %s492_s3 = inlined_call_operand.vmem [shape: f32[96,64], index: 3, kind: input, shape index: {}]   ;;  %s493_s5 = inlined_call_operand.vmem [shape: f32[1,64], index: 5, kind: input, shape index: {}]   ;;  %s494_s6 = inlined_call_operand.<no memory space> [shape: f32[1,1], index: 6, kind: input, shape index: {}]   ;;  %s495_s7 = inlined_call_operand.vmem [shape: f32[2,1], index: 7, kind: output, shape index: {}]  }
   0x1   :  { %v28_v2 = vld [vmem:[%s488_s0] sm:$0x3]  ;;  %vm181_vm3 = vcmask 523264   ;;  %vm209_vm4 = vcmask 785408   ;;  %vm271_vm5 = vcmask 519168   ;;  %vm297_vm6 = vcmask 1041409  }
   0x2   :  { %v48_v1 = vshrl.u32 %v47_v0, 7  ;;  %v59_v3 = vperm.slane %v28_v2, 1  ;;  %v46_v4 = vperm.slane %v28_v2, 0  ;;  %v29_v6 = vld [vmem:[%s490_s1] sm:$0x7]  ;;  %vm300_vm7 = vcmask 517120  }
   0x3   :  { %v77_v9 = vperm.slane %v29_v6, 1  ;;  %v101_v10 = vperm.slane %v29_v6, 2  ;;  %v72_v11 = vperm.slane %v29_v6, 0  ;;  %v347_v34 = vld [vmem:[%s489_s2] ss:$0 sm:$0xff]  ;;  %s351_s2 = smov 64  }
   0x4   :  { %345 = vset.pattern.permute.xlu1 %v48_v1  ;;  %343 = vset.pattern.permute.xlu0 %v48_v1  ;;  %v55_v5 = vadd.s32 8, %v48_v1  ;;  %v39_v6 = vld [vmem:[%s492_s3 + $0x40] sm:$0xff]  ;;  %vm308_vm8 = vcmask 1024  }
   0xc   :  { %64 = vperm.xlu0 %343, %v59_v3   ;;  %51 = vperm.xlu1 %345, %v46_v4  }
  0x14   :  { %344 = vset.pattern.permute.xlu0 %v55_v5  ;;  %346 = vset.pattern.permute.xlu1 %v55_v5  ;;  %v40_v5 = vld [vmem:[%s492_s3 + $0x48] sm:$0xff] }
  0x1c   :  { %70 = vperm.xlu0 %344, %v59_v3   ;;  %57 = vperm.xlu1 %346, %v46_v4   ;;  %v42_v3 = vld [vmem:[%s492_s3 + $0x58] sm:$0xff]  ;;  %v41_v4 = vld [vmem:[%s492_s3 + $0x50] sm:$0xff] }
  0x1d   :  { %318 = vmatpush.msra.mxu2 %v42_v3  ;;  %220 = vmatpush.msra.mxu0 %v42_v3 }
  0x1e   :  { %317 = vmatpush.msra.mxu1 %v42_v3 }
  0x1f   :  { %320 = vmatpush.msra.mxu2 %v41_v4  ;;  %221 = vmatpush.msra.mxu0 %v41_v4 }
  0x20   :  { %319 = vmatpush.msra.mxu1 %v41_v4 }
  0x21   :  { %322 = vmatpush.msra.mxu2 %v40_v5  ;;  %222 = vmatpush.msra.mxu0 %v40_v5 }
  0x22   :  { %321 = vmatpush.msra.mxu1 %v40_v5 }
  0x23   :  { %324 = vmatpush.msra.mxu2 %v39_v6  ;;  %223 = vmatpush.msra.mxu0 %v39_v6 }
  0x24   :  { %323 = vmatpush.msra.mxu1 %v39_v6 }
  0x7e   :  { %v52_v7 = vpop.permute.xlu1 %51  ;;  %v65_v8 = vpop.permute.xlu0 %64 }
  0x7f   :  { %v80_v12 = vmul.f32 %v77_v9, %v65_v8  ;;  %v78_v13 = vmul.f32 %v77_v9, %v52_v7  ;;  %v104_v16 = vmul.f32 %v101_v10, %v65_v8  ;;  %v102_v20 = vmul.f32 %v101_v10, %v52_v7 }
  0x80   :  { %v75_v23 = vmul.f32 %v72_v11, %v65_v8  ;;  %v73_v31 = vmul.f32 %v72_v11, %v52_v7  ;;  %v38_v7 = vld [vmem:[%s492_s3 + $0x38] sm:$0xff]  ;;  %v37_v8 = vld [vmem:[%s492_s3 + $0x30] sm:$0xff] }
  0x81   :  { %v90_v24 = vrot.slane %v80_v12, 1  ;;  %v87_v27 = vrot.slane %v78_v13, 1  ;;  %v114_v32 = vrot.slane %v104_v16, 2  ;;  %v111_v36 = vrot.slane %v102_v20, 2  ;;  %326 = vmatpush.msra.mxu2 %v38_v7  ;;  %224 = vmatpush.msra.mxu0 %v38_v7  ;;  %v33_v12 = vld [vmem:[%s492_s3 + $0x10] sm:$0xff] }
  0x82   :  { %325 = vmatpush.msra.mxu1 %v38_v7 }
  0x83   :  { %328 = vmatpush.msra.mxu2 %v37_v8  ;;  %225 = vmatpush.msra.mxu0 %v37_v8 }
  0x84   :  { %327 = vmatpush.msra.mxu1 %v37_v8  ;;  %v349_v8 = vld [vmem:[%s493_s5] ss:$0 sm:$0xff] }
  0x8e   :  { %v71_v14 = vpop.permute.xlu0 %70  ;;  %v58_v15 = vpop.permute.xlu1 %57 }
  0x8f   :  { %v76_v17 = vmul.f32 %v72_v11, %v71_v14  ;;  %v81_v18 = vmul.f32 %v77_v9, %v71_v14  ;;  %v105_v19 = vmul.f32 %v101_v10, %v71_v14  ;;  %v79_v21 = vmul.f32 %v77_v9, %v58_v15  ;;  %v36_v9 = vld [vmem:[%s492_s3 + $0x28] sm:$0xff] }
  0x90   :  { %v103_v22 = vmul.f32 %v101_v10, %v58_v15  ;;  %v74_v28 = vmul.f32 %v72_v11, %v58_v15  ;;  %330 = vmatpush.msra.mxu2 %v36_v9  ;;  %226 = vmatpush.msra.mxu0 %v36_v9  ;;  %v35_v10 = vld [vmem:[%s492_s3 + $0x20] sm:$0xff]  ;;  %v34_v11 = vld [vmem:[%s492_s3 + $0x18] sm:$0xff]  ;;  %v32_v14 = vld [vmem:[%s492_s3 + $0x8] sm:$0xff] }
  0x91   :  { %v91_v25 = vrot.slane %v81_v18, 1  ;;  %v115_v26 = vrot.slane %v105_v19, 2  ;;  %v88_v29 = vrot.slane %v79_v21, 1  ;;  %329 = vmatpush.msra.mxu1 %v36_v9  ;;  %v31_v15 = vld [vmem:[%s492_s3] sm:$0xff] }
  0x92   :  { %v112_v30 = vrot.slane %v103_v22, 2  ;;  %332 = vmatpush.msra.mxu2 %v35_v10  ;;  %227 = vmatpush.msra.mxu0 %v35_v10 }
  0x93   :  { %v100_v33 = vadd.f32 %v91_v25, %v76_v17  ;;  %v92_v35 = vsel %vm86_vm1, %v90_v24, %v91_v25  ;;  %v98_v37 = vadd.f32 %v88_v29, %v74_v28  ;;  %v89_v38 = vsel %vm86_vm1, %v87_v27, %v88_v29  ;;  %331 = vmatpush.msra.mxu1 %v35_v10 }
  0x94   :  { %v99_v39 = vadd.f32 %v92_v35, %v75_v23  ;;  %v116_v40 = vsel %vm110_vm0, %v114_v32, %v115_v26  ;;  %v97_v42 = vadd.f32 %v89_v38, %v73_v31  ;;  %v113_v43 = vsel %vm110_vm0, %v111_v36, %v112_v30  ;;  %334 = vmatpush.msra.mxu2 %v34_v11  ;;  %v348_v36 = vld [vmem:[%s491_s4] ss:$0 sm:$0xff] }
  0x95   :  { %v124_v41 = vadd.f32 %v115_v26, %v100_v33  ;;  %v122_v44 = vadd.f32 %v112_v30, %v98_v37  ;;  %228 = vmatpush.msra.mxu0 %v34_v11  ;;  %333 = vmatpush.msra.mxu1 %v34_v11 }
  0x96   :  { %v123_v45 = vadd.f32 %v116_v40, %v99_v39  ;;  %v121_v47 = vadd.f32 %v113_v43, %v97_v42  ;;  %336 = vmatpush.msra.mxu2 %v33_v12 }
  0x97   :  { %v131_v46 = vadd.f32 %v347_v34, %v124_v41  ;;  %v129_v48 = vadd.f32 %v347_v34, %v122_v44  ;;  %229 = vmatpush.msra.mxu0 %v33_v12  ;;  %335 = vmatpush.msra.mxu1 %v33_v12 }
  0x98   :  { %v130_v49 = vadd.f32 %v347_v34, %v123_v45  ;;  %v128_v51 = vadd.f32 %v347_v34, %v121_v47  ;;  %338 = vmatpush.msra.mxu2 %v32_v14 }
  0x99   :  { %v406_v50 = vmax.f32 %v131_v46, 0.0  ;;  %v408_v52 = vmax.f32 %v129_v48, 0.0  ;;  %230 = vmatpush.msra.mxu0 %v32_v14  ;;  %337 = vmatpush.msra.mxu1 %v32_v14  ;;  %v12_v48 = vstv %s494_s6 }
  0x9a   :  { %v412_v55 = vmax.f32 %v128_v51, 0.0  ;;  %v415_v57 = vmax.f32 %v130_v49, 0.0  ;;  %340 = vmatpush.msra.mxu2 %v31_v15  ;;  %13 = vst [vmem:[#allocation2] sm:$0x1] %v12_v48 }
  0x9b   :  { %v162_v53 = vrot.slane %v406_v50, 2  ;;  %v144_v54 = vrot.slane %v406_v50, 1  ;;  %v141_v56 = vrot.slane %v408_v52, 1  ;;  %v159_v62 = vrot.slane %v408_v52, 2  ;;  %231 = vmatpush.msra.mxu0 %v31_v15  ;;  %339 = vmatpush.msra.mxu1 %v31_v15 }
  0x9c   :  { %v140_v58 = vrot.slane %v412_v55, 1  ;;  %v143_v60 = vrot.slane %v415_v57, 1  ;;  %v161_v63 = vrot.slane %v415_v57, 2  ;;  %v158_v1 = vrot.slane %v412_v55, 2 }
  0x9d   :  { %170 = vrot.lane.b32.xlu2 %v162_v53, %s351_s2  ;;  %152 = vrot.lane.b32.xlu1 %v144_v54, %s352_s28 }
  0x9e   :  { %v142_v59 = vsel %vm86_vm1, %v140_v58, %v141_v56  ;;  %v145_v61 = vsel %vm86_vm1, %v143_v60, %v144_v54  ;;  %v163_v0 = vsel %vm110_vm0, %v161_v63, %v162_v53  ;;  %v160_v2 = vsel %vm110_vm0, %v158_v1, %v159_v62 }
  0x9f   :  { %146 = vrot.lane.b32.xlu0 %v142_v59, %s352_s28 }
  0xa1   :  { %v350_v14 = vld [vmem:[#allocation2] ss:$0 sm:$0xff] }
  0xa5   :  { %150 = vrot.lane.b32.xlu2 %v145_v61, %s352_s28  ;;  %148 = vrot.lane.b32.xlu1 %v141_v56, %s352_s28 }
  0xa7   :  { %166 = vrot.lane.b32.xlu0 %v159_v62, %s351_s2 }
  0xad   :  { %168 = vrot.lane.b32.xlu2 %v163_v0, %s351_s2 }
  0xb5   :  { %164 = vrot.lane.b32.xlu2 %v160_v2, %s351_s2 }
  0xf7   :  { %v171_v13 = vpop.permute.xlu2 %170 }
  0xff   :  { %v151_v16 = vpop.permute.xlu2 %150 }
 0x100   :  { %v179_v17 = vsel %vm176_vm2, %v415_v57, %v151_v16 }
 0x107   :  { %v169_v18 = vpop.permute.xlu2 %168 }
 0x108   :  { %v184_v19 = vsel %vm181_vm3, %v179_v17, %v169_v18 }
 0x109   :  { %v191_v20 = vrot.slane %v184_v19, 4  ;;  %201 = vst [vmem:[#allocation1 + $0x11] ss:$2 sm:$0xff] %v184_v19 }
 0x10b   :  { %203 = vst [vmem:[#allocation1 + $0x20] ss:$2 sm:$0xff] %v191_v20 }
 0x10f   :  { %v153_v21 = vpop.permute.xlu1 %152  ;;  %v165_v25 = vpop.permute.xlu2 %164 }
 0x110   :  { %v180_v22 = vsel %vm176_vm2, %v406_v50, %v153_v21 }
 0x111   :  { %v185_v23 = vsel %vm181_vm3, %v180_v22, %v171_v13  ;;  %v147_v24 = vpop.permute.xlu0 %146 }
 0x112   :  { %205 = vst [vmem:[#allocation1 + $0x21] ss:$2 sm:$0xff] %v185_v23  ;;  %v177_v26 = vsel %vm176_vm2, %v412_v55, %v147_v24 }
 0x113   :  { %v182_v27 = vsel %vm181_vm3, %v177_v26, %v165_v25 }
 0x114   :  { %v190_v28 = vrot.slane %v182_v27, 4  ;;  %195 = vst [vmem:[#allocation1] ss:$2 sm:$0xff] %v182_v27 }
 0x116   :  { %197 = vst [vmem:[#allocation1 + $0x1] ss:$2 sm:$0xff] %v190_v28 }
 0x117   :  { %v149_v29 = vpop.permute.xlu1 %148 }
 0x118   :  { %v178_v30 = vsel %vm176_vm2, %v408_v52, %v149_v29 }
 0x119   :  { %v208_v31 = vld.sshfl [vmem:[#allocation1 + $0x20] sm:$0xff pattern:$0x75316420]  ;;  %v167_v32 = vpop.permute.xlu0 %166 }
 0x11a   :  { %316 = vmatmul.msk.f32.vlgmr.msra.gmra.mxu2 %vm209_vm4, %v208_v31  ;;  %v183_v33 = vsel %vm181_vm3, %v178_v30, %v167_v32 }
 0x11b   :  { %199 = vst [vmem:[#allocation1 + $0x10] ss:$2 sm:$0xff] %v183_v33 }
 0x11d   :  { %v206_v34 = vld.sshfl [vmem:[#allocation1] sm:$0xff pattern:$0x75316420] }
 0x11e   :  { %314 = vmatmul.msk.f32.vlgmr.msra.gmra.mxu0 %vm209_vm4, %v206_v34 }
 0x122   :  { %v207_v35 = vld.sshfl [vmem:[#allocation1 + $0x10] sm:$0xff pattern:$0x75316420] }
 0x123   :  { %315 = vmatmul.msk.f32.vlgmr.msra.gmra.mxu1 %vm209_vm4, %v207_v35 }
 0x19b   :  { %v233_v37 = vpop.f32.mrf.mxu0 }
 0x19c   :  { %v234_v38 = vadd.f32 %v348_v36, %v233_v37 }
 0x19d   :  { %v239_v39 = vpop.f32.mrf.mxu2 }
 0x19e   :  { %v240_v40 = vadd.f32 %v348_v36, %v239_v39  ;;  %v242_v41 = vmax.f32 %v234_v38, 0.0 }
 0x1a0   :  { %v244_v42 = vmax.f32 %v240_v40, 0.0  ;;  %v248_v43 = vrot.slane %v242_v41, 4  ;;  %251 = vst [vmem:[#allocation1] ss:$2 sm:$0xff] %v242_v41  ;;  %v236_v44 = vpop.f32.mrf.mxu1 }
 0x1a1   :  { %v237_v46 = vadd.f32 %v348_v36, %v236_v44 }
 0x1a2   :  { %v250_v45 = vrot.slane %v244_v42, 4  ;;  %261 = vst [vmem:[#allocation1 + $0x21] ss:$2 sm:$0xff] %v244_v42 }
 0x1a3   :  { %253 = vst [vmem:[#allocation1 + $0x1] ss:$2 sm:$0xff] %v248_v43  ;;  %v243_v47 = vmax.f32 %v237_v46, 0.0 }
 0x1a4   :  { %263 = vst [vmem:[#allocation1 + $0x30] ss:$2 sm:$0xff] %v250_v45 }
 0x1a5   :  { %v249_v49 = vrot.slane %v243_v47, 4  ;;  %255 = vst [vmem:[#allocation1 + $0x10] ss:$2 sm:$0xff] %v243_v47 }
 0x1a7   :  { %259 = vst [vmem:[#allocation1 + $0x20] ss:$2 sm:$0xff] %v249_v49 }
 0x1aa   :  { %v256_v50 = vld.sshfl [vmem:[#allocation1] sm:$0xff pattern:$0x75316420] }
 0x1ab   :  { %v265_v52 = vld.sshfl [vmem:[#allocation1 + $0x30] sm:$0xff pattern:$0x75316420]  ;;  %v270_v53 = vsel %vm181_vm3, %v256_v50, 0.0 }
 0x1ac   :  { %v257_v51 = vld.sshfl [vmem:[#allocation1 + $0x10] sm:$0xff pattern:$0x75316420]  ;;  %v281_v58 = vsel %vm271_vm5, %v265_v52, 0.0 }
 0x1ad   :  { %v272_v54 = vsel %vm271_vm5, %v257_v51, 0.0 }
 0x1ae   :  { %v264_v55 = vld.sshfl [vmem:[#allocation1 + $0x20] sm:$0xff pattern:$0x75316420]  ;;  %v273_v56 = vadd.f32 %v272_v54, %v270_v53 }
 0x1af   :  { %v280_v57 = vsel %vm181_vm3, %v264_v55, 0.0 }
 0x1b0   :  { %v274_v59 = vrot.slane %v273_v56, 4  ;;  %v282_v60 = vadd.f32 %v281_v58, %v280_v57 }
 0x1b2   :  { %v275_v61 = vadd.f32 %v274_v59, %v273_v56  ;;  %v283_v62 = vrot.slane %v282_v60, 4 }
 0x1b4   :  { %v276_v63 = vrot.slane %v275_v61, 2  ;;  %v284_v0 = vadd.f32 %v283_v62, %v282_v60 }
 0x1b6   :  { %v277_v1 = vadd.f32 %v276_v63, %v275_v61  ;;  %v285_v2 = vrot.slane %v284_v0, 2 }
 0x1b8   :  { %v278_v3 = vrot.slane %v277_v1, 1  ;;  %v286_v4 = vadd.f32 %v285_v2, %v284_v0 }
 0x1ba   :  { %v287_v5 = vrot.slane %v286_v4, 1  ;;  %v279_v6 = vadd.f32 %v278_v3, %v277_v1 }
 0x1bc   :  { %v288_v7 = vadd.f32 %v287_v5, %v286_v4  ;;  %v292_v10 = vmul.f32 %v349_v8, %v279_v6 }
 0x1be   :  { %v293_v9 = vmul.f32 %v349_v8, %v288_v7 }
 0x1c0   :  { %v296_v11 = vrot.slane %v293_v9, 7 }
 0x1c2   :  { %v298_v12 = vsel %vm297_vm6, %v296_v11, %v292_v10 }
 0x1c3   :  { %v301_v13 = vsel %vm300_vm7, %v298_v12, 0.0 }
 0x1c4   :  { %302 = vadd.xlane.f32.xlu1 %v301_v13 }
 0x237   :  { %v303_v15 = vpop.xlane.xlu1 %302 }
 0x238   :  { %v307_v16 = vadd.f32 %v350_v14, %v303_v15 }
 0x23a   :  { %309 = vst.msk [vmem:[%s495_s7] sm:$0x3] %vm308_vm8, %v307_v16 }

</bundles_post_ra>
